<compile_context>
chip_gen: v6e
topology: v6e:2x2x1
jax: 0.10.0
libtpu: 0.0.40
codegen_flags: <defaults>
</compile_context>

<pallas_src>
import numpy as np
import jax
import jax.numpy as jnp
from jax.experimental import pallas as pl
from jax.experimental.pallas import tpu as pltpu


def _build_pe(d_model: int, max_len: int = 200, dtype=jnp.float32) -> jnp.ndarray:
    """Deterministic sinusoidal positional-encoding table, shape (max_len, d_model).

    Build it in the dtype you will run the model in (e.g. bf16) so the kernel never
    mixes dtypes (mixed f32 pe / bf16 x would force per-element upcasts + 2x pe bytes).
    """
    pe = np.zeros((max_len, d_model), dtype=np.float32)
    pos = np.arange(0, max_len, dtype=np.float32)[:, None]                 # (max_len, 1)
    div = np.exp(np.arange(0, d_model, 2, dtype=np.float32)
                 * (-np.log(10000.0) / d_model))                           # (ceil(d/2),)
    pe[:, 0::2] = np.sin(pos * div)
    pe[:, 1::2] = np.cos(pos * div[: pe[:, 1::2].shape[1]])
    return jnp.asarray(pe, dtype=dtype)                                    # (max_len, d_model)


def _add_pe_kernel(x_ref, pe_ref, o_ref):
    # Both refs are 2-D tiles of identical shape -> pure vreg-for-vreg add,
    # no broadcast, no reshape.
    o_ref[...] = x_ref[...] + pe_ref[...]


def _pick_row_tile(n_rows: int, itemsize: int, target_bytes: int = 2 * 1024 * 1024) -> int:
    """Largest clean row tile (multiple of 8, divides n_rows) with ~target_bytes per
    (TR, 128) tile.  Falls back to the full extent if no clean divisor exists."""
    target = max(8, target_bytes // (128 * itemsize))
    if n_rows <= target:
        return n_rows
    for t in range(min(target, n_rows - 1), 7, -1):
        if t % 8 == 0 and n_rows % t == 0:
            return t
    return n_rows


def positional_encoding_forward(x: jnp.ndarray, pe: jnp.ndarray) -> jnp.ndarray:
    """x: (B, S, D); pe: (max_len, D). Returns x + pe[-S:, :]."""
    B, S, D = x.shape
    max_len = pe.shape[0]

    if pe.dtype != x.dtype:
        # Match dtypes once (ideally build pe in the model dtype instead; see _build_pe).
        pe = pe.astype(x.dtype)

    L = S * D
    itemsize = jnp.dtype(x.dtype).itemsize

    # ------------------------------------------------------------------ fallback path
    if L % 128 != 0:
        # Not lane-packable: keep (S, D) blocks (full-extent last dims are legal).
        # TODO(synk): tile S here too for very long non-128-aligned sequences.
        pe_slice = pe[max_len - S:, :]
        return pl.pallas_call(
            _add_pe_kernel,
            out_shape=jax.ShapeDtypeStruct((B, S, D), x.dtype),
            grid_spec=pltpu.PrefetchScalarGridSpec(
                num_scalar_prefetch=0,
                grid=(B,),
                in_specs=[
                    pl.BlockSpec((pl.Squeezed(), S, D), lambda b: (b, 0, 0)),
                    pl.BlockSpec((S, D), lambda b: (0, 0)),
                ],
                out_specs=pl.BlockSpec((pl.Squeezed(), S, D), lambda b: (b, 0, 0)),
            ),
            compiler_params=pltpu.CompilerParams(
                dimension_semantics=("parallel",),
            ),
        )(x, pe_slice)

    # ----------------------------------------------------------------- lane-dense path
    R = L // 128                       # rows of the lane-dense (R, 128) view
    TR = _pick_row_tile(R, itemsize)   # row tile: multiple of 8 dividing R, or R itself
    n_r = R // TR

    x2 = x.reshape(B, R, 128)          # layout plumbing only (bitcast-level reshape)

    # pe addend: prefer reading the full table directly with the "last S rows" offset
    # folded into the index_map (no wrapper-side slice) when everything is block-aligned.
    elem_off = (max_len - S) * D
    r_full = (max_len * D) // 128 if (max_len * D) % 128 == 0 else -1
    can_fold = (
        r_full > 0
        and elem_off % 128 == 0
        and (elem_off // 128) % TR == 0
        and (TR % 8 == 0 or TR == r_full)      # keep the pe block shape TPU-legal
    )
    if can_fold:
        pe_rows = pe.reshape(r_full, 128)
        r_block_off = (elem_off // 128) // TR
    else:
        pe_rows = pe[max_len - S:, :].reshape(R, 128)
        r_block_off = 0

    out2 = pl.pallas_call(
        _add_pe_kernel,
        out_shape=jax.ShapeDtypeStruct((B, R, 128), x.dtype),
        grid_spec=pltpu.PrefetchScalarGridSpec(
            num_scalar_prefetch=0,
            # Batch innermost: pe's block index is constant along it, so the pe tile
            # stays VMEM-resident (one HBM fetch per row tile, not per batch element).
            grid=(n_r, B),
            in_specs=[
                pl.BlockSpec((pl.Squeezed(), TR, 128), lambda r, b: (b, r, 0)),
                pl.BlockSpec((TR, 128), lambda r, b: (r_block_off + r, 0)),
            ],
            out_specs=pl.BlockSpec((pl.Squeezed(), TR, 128), lambda r, b: (b, r, 0)),
        ),
        compiler_params=pltpu.CompilerParams(
            dimension_semantics=("parallel", "parallel"),
            vmem_limit_bytes=32 * 1024 * 1024,   # headroom for the ~2 MiB double-buffered tiles
        ),
    )(x2, pe_rows)

    return out2.reshape(B, S, D)


if __name__ == "__main__":
    B, S, D = 2, 8, 32
    max_len = 200

    key = jax.random.PRNGKey(0)
    x = jax.random.normal(key, (B, S, D), dtype=jnp.float32)

    pe = _build_pe(D, max_len)

    fwd = jax.jit(positional_encoding_forward)
    out = fwd(x, pe)
    out = jax.block_until_ready(out)

    # Reference check in plain JAX (same math as the PyTorch forward).
    ref = x + pe[-S:, :][None, :, :]
    np.testing.assert_allclose(np.asarray(out), np.asarray(ref), rtol=1e-6, atol=1e-6)

    print("KERNEL_OK")
</pallas_src>

<mosaic_0001>
module attributes {stable_mosaic.version = 11 : i64} {
  func.func @_add_pe_kernel(%arg0: i32, %arg1: i32, %arg2: memref<1x2x128xf32, #tpu.memory_space<vmem>>, %arg3: memref<2x128xf32, #tpu.memory_space<vmem>>, %arg4: memref<1x2x128xf32, #tpu.memory_space<vmem>>) attributes {dimension_semantics = [#tpu.dimension_semantics<parallel>, #tpu.dimension_semantics<parallel>], iteration_bounds = array<i64: 1, 2>, scalar_prefetch = 0 : i64, scratch_operands = 0 : i64, tpu.core_type = #tpu.core_type<tc>, window_params = [{transform_indices = @transform_0, window_bounds = array<i64: 1, 2, 128>}, {transform_indices = @transform_1, window_bounds = array<i64: 2, 128>}, {transform_indices = @transform_2, window_bounds = array<i64: 1, 2, 128>}]} {
    %c0 = arith.constant 0 : index
    %c0_0 = arith.constant 0 : index
    %c0_1 = arith.constant 0 : index
    %0 = vector.load %arg2[%c0, %c0_0, %c0_1] : memref<1x2x128xf32, #tpu.memory_space<vmem>>, vector<1x2x128xf32>
    %1 = vector.shape_cast %0 : vector<1x2x128xf32> to vector<2x128xf32>
    %c0_2 = arith.constant 0 : index
    %c0_3 = arith.constant 0 : index
    %2 = vector.load %arg3[%c0_2, %c0_3] : memref<2x128xf32, #tpu.memory_space<vmem>>, vector<2x128xf32>
    %3 = arith.addf %1, %2 : vector<2x128xf32>
    %c0_4 = arith.constant 0 : index
    %c0_5 = arith.constant 0 : index
    %c0_6 = arith.constant 0 : index
    %4 = vector.load %arg4[%c0_4, %c0_5, %c0_6] : memref<1x2x128xf32, #tpu.memory_space<vmem>>, vector<1x2x128xf32>
    %5 = vector.shape_cast %4 : vector<1x2x128xf32> to vector<2x128xf32>
    %6 = vector.shape_cast %3 : vector<2x128xf32> to vector<1x2x128xf32>
    tpu.vector_store %arg4[%c0_4, %c0_5, %c0_6], %6 {strides = array<i32>} : memref<1x2x128xf32, #tpu.memory_space<vmem>>, vector<1x2x128xf32>,
    return
  }
  func.func @transform_0(%arg0: i32, %arg1: i32) -> (i32, i32, i32) {
    %c0_i32 = arith.constant 0 : i32
    %c0_i32_0 = arith.constant 0 : i32
    return %arg1, %arg0, %c0_i32 : i32, i32, i32
  }
  func.func @transform_1(%arg0: i32, %arg1: i32) -> (i32, i32) {
    %c0_i32 = arith.constant 0 : i32
    %0 = arith.addi %c0_i32, %arg0 : i32
    %c0_i32_0 = arith.constant 0 : i32
    %c0_i32_1 = arith.constant 0 : i32
    return %0, %c0_i32_0 : i32, i32
  }
  func.func @transform_2(%arg0: i32, %arg1: i32) -> (i32, i32, i32) {
    %c0_i32 = arith.constant 0 : i32
    %c0_i32_0 = arith.constant 0 : i32
    return %arg1, %arg0, %c0_i32 : i32, i32, i32
  }
}

</mosaic_0001>

<bundles_post_ra>
// kernel: positional_encoding_forward.1
= control target key start
LH: loop header
LB: loop body
LE: loop exit
PB: predicated region body
PF: predicated region fallthrough
CT: control target
= control target key end

     0   :  { %s354_s9 = smov 0   ;;  %s331_s10 = smov 0   ;;  %s368_s0 = inlined_call_operand.vmem [shape: f32[2,2,128], index: 0, kind: input, shape index: {}]   ;;  %s369_s1 = inlined_call_operand.vmem [shape: f32[2,128], index: 1, kind: input, shape index: {}]   ;;  %s370_s2 = inlined_call_operand.vmem [shape: f32[2,2,128], index: 2, kind: output, shape index: {}]  }
   0x1   :  { %s335_s11 = smov 0  }
   0x2 LB: > { %s21_s12 = sadd.s32 1, %s333_s10  ;;  %p286_p0 = scmp.ge.s32.totalorder %s337_s11, 1  ;;  %s337_s11 = sphi %s335_s11, %s12_s11   ;;  %s333_s10 = sphi %s331_s10, %s332_s10   ;;  %s329_s9 = sphi %s354_s9, %s371_s9  }
   0x3   : > { %p22_p1 = scmp.ge.s32.totalorder %s21_s12, 2  ;;  %p139_p2 = scmp.lt.s32.totalorder %s337_s11, 3 }
   0x5   : > { %s373_s12 = smov (%p22_p1, %s21_s12), 0  ;;  %p140_p3 = pnand %p286_p0, %p139_p2 }
   0x6   : > { %p169_p4 = scmp.lt.s32.totalorder (!%p140_p3), %s329_s9, 1 }
   0x7   : > { %143 = sbr.rel (%p140_p3) target bundleno = 19 (0x13), region = 28 }
   0xc   : > { %s375_s9 = smov (!%p169_p4, %s329_s9), 1  ;;  %v188_v0 = vld [vmem:[%s369_s1] sm:$0x3] }
   0xd   : > { %s287_s13 = sshll.u32 %s375_s9, 1 }
   0xe   : > { %s175_s18 = scalar_lea.vmem %s368_s0, %s287_s13  ;;  %s186_s21 = scalar_lea.vmem %s370_s2, %s287_s13 }
   0xf   : > { %v187_v1 = vld [vmem:[%s175_s18] sm:$0x3] }
  0x10   : > { %v189_v2 = vadd.f32 %v188_v0, %v187_v1 }
  0x12   : > { %190 = vst [vmem:[%s186_s21] sm:$0x3] %v189_v2 }
  0x13 PF: > { %s12_s11 = sadd.s32 1, %s337_s11   ;;  %s371_s9 = smov %s333_s10 }
  0x14   : > { %p9_p5 = scmp.ge.s32.totalorder %s12_s11, 4   ;;  %s332_s10 = smov %s373_s12  }
  0x16   :  { %11 = sbr.rel (!%p9_p5) target bundleno = 2 (0x2), region = 61 }

</bundles_post_ra>
